<compile_context>
chip_gen: v7x
topology: tpu7x:2x2x1
jax: 0.10.0
libtpu: 0.0.40
codegen_flags: <defaults>
</compile_context>

<pallas_src>
import functools

import jax
import jax.numpy as jnp
from jax.experimental import pallas as pl
from jax.experimental.pallas import tpu as pltpu

# Hidden-layer widths from the PyTorch module definition.
_HIDDEN = (256, 200, 128, 100, 64, 32, 16)
_NEG_SLOPE = 0.01  # PyTorch nn.LeakyReLU default negative_slope
_LANE = 128
_SUBLANE = 8


def _round_up(n, m):
    return ((n + m - 1) // m) * m


def _generator_kernel(*refs):
    """refs = (x_ref, w1, b1, ..., w8, b8, o_ref); x/o are (TB, dim) tiles,
    weights/biases are full (padded) arrays resident in VMEM."""
    x_ref = refs[0]
    o_ref = refs[-1]
    param_refs = refs[1:-1]
    n_layers = len(param_refs) // 2

    h = x_ref[...].astype(jnp.float32)
    for i in range(n_layers):
        w = param_refs[2 * i][...]        # [in_pad_i, out_pad_i]
        b = param_refs[2 * i + 1][...]    # [1, out_pad_i]
        # Cast activations to the weight dtype (no-op for f32, bf16 MXU path
        # on v6e/v7x when params are stored bf16); accumulate in f32.
        h = jnp.dot(h.astype(w.dtype), w, preferred_element_type=jnp.float32)
        h = h + b.astype(jnp.float32)
        if i < n_layers - 1:
            # LeakyReLU(0.01): mul+max (2 VALU ops), f32 on the VPU (v5e-safe).
            h = jnp.maximum(h, _NEG_SLOPE * h)
    o_ref[...] = h.astype(o_ref.dtype)


def init_generator_params(key, input_dim, output_dim):
    """Deterministic params matching the PyTorch layer shapes.

    PyTorch nn.Linear default init: U(-1/sqrt(fan_in), 1/sqrt(fan_in)) for both
    weight and bias. Weight is stored transposed ([in, out]) for the kernel.
    """
    dims = (input_dim,) + _HIDDEN + (output_dim,)
    params = []
    for in_d, out_d in zip(dims[:-1], dims[1:]):
        key, kw, kb = jax.random.split(key, 3)
        bound = 1.0 / float(in_d) ** 0.5
        w = jax.random.uniform(kw, (in_d, out_d), jnp.float32, -bound, bound)
        b = jax.random.uniform(kb, (1, out_d), jnp.float32, -bound, bound)
        params.append((w, b))
    return params


def pad_generator_params(params, dtype=jnp.float32):
    """Zero-pad every weight/bias so all dims are multiples of 128 (lane-dense).

    Padding is exactly zero, so padded lanes stay zero through bias-add and
    LeakyReLU and never leak into the real output block.
    Use dtype=jnp.bfloat16 on v6e/v7x to halve weight DMA / vreg footprint
    (loosens the numerical tolerance vs the f32 reference).
    """
    padded = []
    for w, b in params:
        in_d, out_d = w.shape
        in_p, out_p = _round_up(in_d, _LANE), _round_up(out_d, _LANE)
        w_p = jnp.zeros((in_p, out_p), dtype).at[:in_d, :out_d].set(w.astype(dtype))
        b_p = jnp.zeros((1, out_p), dtype).at[:, :out_d].set(b.astype(dtype))
        padded.append((w_p, b_p))
    return padded


@functools.partial(jax.jit, static_argnames=("output_dim",))
def generator_forward(x, padded_params, *, output_dim):
    """x: [B, input_dim] float32 -> [B, output_dim] float32."""
    batch, in_dim = x.shape
    in_pad = padded_params[0][0].shape[0]
    out_pad = padded_params[-1][0].shape[1]

    # Batch tile: 128 rows of f32 activations (vreg-safe), shrink for tiny B.
    tb = min(128, _round_up(batch, _SUBLANE))
    batch_pad = _round_up(batch, tb)

    # Lane-dense, zero-padded input slab.
    x_p = jnp.zeros((batch_pad, in_pad), jnp.float32).at[:batch, :in_dim].set(x)

    flat = []
    in_specs = [pl.BlockSpec((tb, in_pad), lambda i: (i, 0))]
    for w, b in padded_params:
        flat.extend([w, b])
        # Constant index_map: weights/biases DMA'd once, VMEM-resident.
        in_specs.append(pl.BlockSpec(w.shape, lambda i: (0, 0)))
        in_specs.append(pl.BlockSpec(b.shape, lambda i: (0, 0)))

    out = pl.pallas_call(
        _generator_kernel,
        out_shape=jax.ShapeDtypeStruct((batch_pad, out_pad), jnp.float32),
        grid=(batch_pad // tb,),
        in_specs=in_specs,
        out_specs=pl.BlockSpec((tb, out_pad), lambda i: (i, 0)),
        compiler_params=pltpu.CompilerParams(
            dimension_semantics=("parallel",)),  # 2-TC sharding on v7x
    )(x_p, *flat)

    return out[:batch, :output_dim]


def generator_reference(x, params):
    """Pure-JAX reference for correctness checking (unpadded params)."""
    h = x
    n = len(params)
    for i, (w, b) in enumerate(params):
        h = h @ w + b
        if i < n - 1:
            h = jnp.where(h > 0, h, _NEG_SLOPE * h)
    return h


if __name__ == "__main__":
    INPUT_DIM = 32
    OUTPUT_DIM = 8
    BATCH = 8

    key = jax.random.PRNGKey(0)
    k_params, k_x = jax.random.split(key)

    params = init_generator_params(k_params, INPUT_DIM, OUTPUT_DIM)
    padded_params = pad_generator_params(params)  # dtype=jnp.bfloat16 on v6e/v7x
    x = jax.random.normal(k_x, (BATCH, INPUT_DIM), dtype=jnp.float32)

    out = generator_forward(x, padded_params, output_dim=OUTPUT_DIM)
    out = jax.block_until_ready(out)

    ref = generator_reference(x, params)
    assert out.shape == (BATCH, OUTPUT_DIM), out.shape
    assert jnp.allclose(out, ref, atol=1e-4, rtol=1e-4), "mismatch vs reference"

    print("KERNEL_OK")
</pallas_src>

<mosaic_0001>
module attributes {stable_mosaic.version = 11 : i64} {
  func.func @_generator_kernel(%arg0: i32, %arg1: memref<8x128xf32, #tpu.memory_space<vmem>>, %arg2: memref<128x256xf32, #tpu.memory_space<vmem>>, %arg3: memref<1x256xf32, #tpu.memory_space<vmem>>, %arg4: memref<256x256xf32, #tpu.memory_space<vmem>>, %arg5: memref<1x256xf32, #tpu.memory_space<vmem>>, %arg6: memref<256x128xf32, #tpu.memory_space<vmem>>, %arg7: memref<1x128xf32, #tpu.memory_space<vmem>>, %arg8: memref<128x128xf32, #tpu.memory_space<vmem>>, %arg9: memref<1x128xf32, #tpu.memory_space<vmem>>, %arg10: memref<128x128xf32, #tpu.memory_space<vmem>>, %arg11: memref<1x128xf32, #tpu.memory_space<vmem>>, %arg12: memref<128x128xf32, #tpu.memory_space<vmem>>, %arg13: memref<1x128xf32, #tpu.memory_space<vmem>>, %arg14: memref<128x128xf32, #tpu.memory_space<vmem>>, %arg15: memref<1x128xf32, #tpu.memory_space<vmem>>, %arg16: memref<128x128xf32, #tpu.memory_space<vmem>>, %arg17: memref<1x128xf32, #tpu.memory_space<vmem>>, %arg18: memref<8x128xf32, #tpu.memory_space<vmem>>) attributes {dimension_semantics = [#tpu.dimension_semantics<parallel>], iteration_bounds = array<i64: 1>, scalar_prefetch = 0 : i64, scratch_operands = 0 : i64, tpu.core_type = #tpu.core_type<tc>, window_params = [{transform_indices = @transform_0, window_bounds = array<i64: 8, 128>}, {pipeline_mode = #tpu.pipeline_mode<synchronous>, transform_indices = @transform_1, window_bounds = array<i64: 128, 256>}, {pipeline_mode = #tpu.pipeline_mode<synchronous>, transform_indices = @transform_2, window_bounds = array<i64: 1, 256>}, {pipeline_mode = #tpu.pipeline_mode<synchronous>, transform_indices = @transform_3, window_bounds = array<i64: 256, 256>}, {pipeline_mode = #tpu.pipeline_mode<synchronous>, transform_indices = @transform_4, window_bounds = array<i64: 1, 256>}, {pipeline_mode = #tpu.pipeline_mode<synchronous>, transform_indices = @transform_5, window_bounds = array<i64: 256, 128>}, {pipeline_mode = #tpu.pipeline_mode<synchronous>, transform_indices = @transform_6, window_bounds = array<i64: 1, 128>}, {pipeline_mode = #tpu.pipeline_mode<synchronous>, transform_indices = @transform_7, window_bounds = array<i64: 128, 128>}, {pipeline_mode = #tpu.pipeline_mode<synchronous>, transform_indices = @transform_8, window_bounds = array<i64: 1, 128>}, {pipeline_mode = #tpu.pipeline_mode<synchronous>, transform_indices = @transform_9, window_bounds = array<i64: 128, 128>}, {pipeline_mode = #tpu.pipeline_mode<synchronous>, transform_indices = @transform_10, window_bounds = array<i64: 1, 128>}, {pipeline_mode = #tpu.pipeline_mode<synchronous>, transform_indices = @transform_11, window_bounds = array<i64: 128, 128>}, {pipeline_mode = #tpu.pipeline_mode<synchronous>, transform_indices = @transform_12, window_bounds = array<i64: 1, 128>}, {pipeline_mode = #tpu.pipeline_mode<synchronous>, transform_indices = @transform_13, window_bounds = array<i64: 128, 128>}, {pipeline_mode = #tpu.pipeline_mode<synchronous>, transform_indices = @transform_14, window_bounds = array<i64: 1, 128>}, {pipeline_mode = #tpu.pipeline_mode<synchronous>, transform_indices = @transform_15, window_bounds = array<i64: 128, 128>}, {pipeline_mode = #tpu.pipeline_mode<synchronous>, transform_indices = @transform_16, window_bounds = array<i64: 1, 128>}, {transform_indices = @transform_17, window_bounds = array<i64: 8, 128>}]} {
    %c0 = arith.constant 0 : index
    %c0_0 = arith.constant 0 : index
    %0 = vector.load %arg1[%c0, %c0_0] : memref<8x128xf32, #tpu.memory_space<vmem>>, vector<8x128xf32>
    %c0_1 = arith.constant 0 : index
    %c0_2 = arith.constant 0 : index
    %1 = vector.load %arg2[%c0_1, %c0_2] : memref<128x256xf32, #tpu.memory_space<vmem>>, vector<128x256xf32>
    %c0_3 = arith.constant 0 : index
    %c0_4 = arith.constant 0 : index
    %2 = vector.load %arg3[%c0_3, %c0_4] : memref<1x256xf32, #tpu.memory_space<vmem>>, vector<1x256xf32>
    %cst = arith.constant dense<0.000000e+00> : vector<8x256xf32>
    %3 = tpu.matmul %0, %1, %cst {dimension_numbers = #tpu.dot_dimension_numbers<[1], [0], [0], [1], [0, 0, 1, 1], [], []>} : vector<8x128xf32>, vector<128x256xf32>, vector<8x256xf32> -> vector<8x256xf32>
    %4 = vector.broadcast %2 : vector<1x256xf32> to vector<8x256xf32>
    %5 = arith.addf %3, %4 : vector<8x256xf32>
    %cst_5 = arith.constant 0.00999999977 : f32
    %6 = vector.broadcast %cst_5 : f32 to vector<8x256xf32>
    %7 = arith.mulf %6, %5 : vector<8x256xf32>
    %8 = arith.maximumf %5, %7 : vector<8x256xf32>
    %c0_6 = arith.constant 0 : index
    %c0_7 = arith.constant 0 : index
    %9 = vector.load %arg4[%c0_6, %c0_7] : memref<256x256xf32, #tpu.memory_space<vmem>>, vector<256x256xf32>
    %c0_8 = arith.constant 0 : index
    %c0_9 = arith.constant 0 : index
    %10 = vector.load %arg5[%c0_8, %c0_9] : memref<1x256xf32, #tpu.memory_space<vmem>>, vector<1x256xf32>
    %cst_10 = arith.constant dense<0.000000e+00> : vector<8x256xf32>
    %11 = tpu.matmul %8, %9, %cst_10 {dimension_numbers = #tpu.dot_dimension_numbers<[1], [0], [0], [1], [0, 0, 1, 1], [], []>} : vector<8x256xf32>, vector<256x256xf32>, vector<8x256xf32> -> vector<8x256xf32>
    %12 = vector.broadcast %10 : vector<1x256xf32> to vector<8x256xf32>
    %13 = arith.addf %11, %12 : vector<8x256xf32>
    %cst_11 = arith.constant 0.00999999977 : f32
    %14 = vector.broadcast %cst_11 : f32 to vector<8x256xf32>
    %15 = arith.mulf %14, %13 : vector<8x256xf32>
    %16 = arith.maximumf %13, %15 : vector<8x256xf32>
    %c0_12 = arith.constant 0 : index
    %c0_13 = arith.constant 0 : index
    %17 = vector.load %arg6[%c0_12, %c0_13] : memref<256x128xf32, #tpu.memory_space<vmem>>, vector<256x128xf32>
    %c0_14 = arith.constant 0 : index
    %c0_15 = arith.constant 0 : index
    %18 = vector.load %arg7[%c0_14, %c0_15] : memref<1x128xf32, #tpu.memory_space<vmem>>, vector<1x128xf32>
    %cst_16 = arith.constant dense<0.000000e+00> : vector<8x128xf32>
    %19 = tpu.matmul %16, %17, %cst_16 {dimension_numbers = #tpu.dot_dimension_numbers<[1], [0], [0], [1], [0, 0, 1, 1], [], []>} : vector<8x256xf32>, vector<256x128xf32>, vector<8x128xf32> -> vector<8x128xf32>
    %20 = vector.broadcast %18 : vector<1x128xf32> to vector<8x128xf32>
    %21 = arith.addf %19, %20 : vector<8x128xf32>
    %cst_17 = arith.constant 0.00999999977 : f32
    %22 = vector.broadcast %cst_17 : f32 to vector<8x128xf32>
    %23 = arith.mulf %22, %21 : vector<8x128xf32>
    %24 = arith.maximumf %21, %23 : vector<8x128xf32>
    %c0_18 = arith.constant 0 : index
    %c0_19 = arith.constant 0 : index
    %25 = vector.load %arg8[%c0_18, %c0_19] : memref<128x128xf32, #tpu.memory_space<vmem>>, vector<128x128xf32>
    %c0_20 = arith.constant 0 : index
    %c0_21 = arith.constant 0 : index
    %26 = vector.load %arg9[%c0_20, %c0_21] : memref<1x128xf32, #tpu.memory_space<vmem>>, vector<1x128xf32>
    %cst_22 = arith.constant dense<0.000000e+00> : vector<8x128xf32>
    %27 = tpu.matmul %24, %25, %cst_22 {dimension_numbers = #tpu.dot_dimension_numbers<[1], [0], [0], [1], [0, 0, 1, 1], [], []>} : vector<8x128xf32>, vector<128x128xf32>, vector<8x128xf32> -> vector<8x128xf32>
    %28 = vector.broadcast %26 : vector<1x128xf32> to vector<8x128xf32>
    %29 = arith.addf %27, %28 : vector<8x128xf32>
    %cst_23 = arith.constant 0.00999999977 : f32
    %30 = vector.broadcast %cst_23 : f32 to vector<8x128xf32>
    %31 = arith.mulf %30, %29 : vector<8x128xf32>
    %32 = arith.maximumf %29, %31 : vector<8x128xf32>
    %c0_24 = arith.constant 0 : index
    %c0_25 = arith.constant 0 : index
    %33 = vector.load %arg10[%c0_24, %c0_25] : memref<128x128xf32, #tpu.memory_space<vmem>>, vector<128x128xf32>
    %c0_26 = arith.constant 0 : index
    %c0_27 = arith.constant 0 : index
    %34 = vector.load %arg11[%c0_26, %c0_27] : memref<1x128xf32, #tpu.memory_space<vmem>>, vector<1x128xf32>
    %cst_28 = arith.constant dense<0.000000e+00> : vector<8x128xf32>
    %35 = tpu.matmul %32, %33, %cst_28 {dimension_numbers = #tpu.dot_dimension_numbers<[1], [0], [0], [1], [0, 0, 1, 1], [], []>} : vector<8x128xf32>, vector<128x128xf32>, vector<8x128xf32> -> vector<8x128xf32>
    %36 = vector.broadcast %34 : vector<1x128xf32> to vector<8x128xf32>
    %37 = arith.addf %35, %36 : vector<8x128xf32>
    %cst_29 = arith.constant 0.00999999977 : f32
    %38 = vector.broadcast %cst_29 : f32 to vector<8x128xf32>
    %39 = arith.mulf %38, %37 : vector<8x128xf32>
    %40 = arith.maximumf %37, %39 : vector<8x128xf32>
    %c0_30 = arith.constant 0 : index
    %c0_31 = arith.constant 0 : index
    %41 = vector.load %arg12[%c0_30, %c0_31] : memref<128x128xf32, #tpu.memory_space<vmem>>, vector<128x128xf32>
    %c0_32 = arith.constant 0 : index
    %c0_33 = arith.constant 0 : index
    %42 = vector.load %arg13[%c0_32, %c0_33] : memref<1x128xf32, #tpu.memory_space<vmem>>, vector<1x128xf32>
    %cst_34 = arith.constant dense<0.000000e+00> : vector<8x128xf32>
    %43 = tpu.matmul %40, %41, %cst_34 {dimension_numbers = #tpu.dot_dimension_numbers<[1], [0], [0], [1], [0, 0, 1, 1], [], []>} : vector<8x128xf32>, vector<128x128xf32>, vector<8x128xf32> -> vector<8x128xf32>
    %44 = vector.broadcast %42 : vector<1x128xf32> to vector<8x128xf32>
    %45 = arith.addf %43, %44 : vector<8x128xf32>
    %cst_35 = arith.constant 0.00999999977 : f32
    %46 = vector.broadcast %cst_35 : f32 to vector<8x128xf32>
    %47 = arith.mulf %46, %45 : vector<8x128xf32>
    %48 = arith.maximumf %45, %47 : vector<8x128xf32>
    %c0_36 = arith.constant 0 : index
    %c0_37 = arith.constant 0 : index
    %49 = vector.load %arg14[%c0_36, %c0_37] : memref<128x128xf32, #tpu.memory_space<vmem>>, vector<128x128xf32>
    %c0_38 = arith.constant 0 : index
    %c0_39 = arith.constant 0 : index
    %50 = vector.load %arg15[%c0_38, %c0_39] : memref<1x128xf32, #tpu.memory_space<vmem>>, vector<1x128xf32>
    %cst_40 = arith.constant dense<0.000000e+00> : vector<8x128xf32>
    %51 = tpu.matmul %48, %49, %cst_40 {dimension_numbers = #tpu.dot_dimension_numbers<[1], [0], [0], [1], [0, 0, 1, 1], [], []>} : vector<8x128xf32>, vector<128x128xf32>, vector<8x128xf32> -> vector<8x128xf32>
    %52 = vector.broadcast %50 : vector<1x128xf32> to vector<8x128xf32>
    %53 = arith.addf %51, %52 : vector<8x128xf32>
    %cst_41 = arith.constant 0.00999999977 : f32
    %54 = vector.broadcast %cst_41 : f32 to vector<8x128xf32>
    %55 = arith.mulf %54, %53 : vector<8x128xf32>
    %56 = arith.maximumf %53, %55 : vector<8x128xf32>
    %c0_42 = arith.constant 0 : index
    %c0_43 = arith.constant 0 : index
    %57 = vector.load %arg16[%c0_42, %c0_43] : memref<128x128xf32, #tpu.memory_space<vmem>>, vector<128x128xf32>
    %c0_44 = arith.constant 0 : index
    %c0_45 = arith.constant 0 : index
    %58 = vector.load %arg17[%c0_44, %c0_45] : memref<1x128xf32, #tpu.memory_space<vmem>>, vector<1x128xf32>
    %cst_46 = arith.constant dense<0.000000e+00> : vector<8x128xf32>
    %59 = tpu.matmul %56, %57, %cst_46 {dimension_numbers = #tpu.dot_dimension_numbers<[1], [0], [0], [1], [0, 0, 1, 1], [], []>} : vector<8x128xf32>, vector<128x128xf32>, vector<8x128xf32> -> vector<8x128xf32>
    %60 = vector.broadcast %58 : vector<1x128xf32> to vector<8x128xf32>
    %61 = arith.addf %59, %60 : vector<8x128xf32>
    %c0_47 = arith.constant 0 : index
    %c0_48 = arith.constant 0 : index
    %62 = vector.load %arg18[%c0_47, %c0_48] : memref<8x128xf32, #tpu.memory_space<vmem>>, vector<8x128xf32>
    tpu.vector_store %arg18[%c0_47, %c0_48], %61 {strides = array<i32>} : memref<8x128xf32, #tpu.memory_space<vmem>>, vector<8x128xf32>,
    return
  }
  func.func @transform_0(%arg0: i32) -> (i32, i32) {
    %c0_i32 = arith.constant 0 : i32
    %c0_i32_0 = arith.constant 0 : i32
    return %arg0, %c0_i32 : i32, i32
  }
  func.func @transform_1(%arg0: i32) -> (i32, i32) {
    %c0_i32 = arith.constant 0 : i32
    %c0_i32_0 = arith.constant 0 : i32
    %c0_i32_1 = arith.constant 0 : i32
    return %c0_i32, %c0_i32_0 : i32, i32
  }
  func.func @transform_2(%arg0: i32) -> (i32, i32) {
    %c0_i32 = arith.constant 0 : i32
    %c0_i32_0 = arith.constant 0 : i32
    %c0_i32_1 = arith.constant 0 : i32
    return %c0_i32, %c0_i32_0 : i32, i32
  }
  func.func @transform_3(%arg0: i32) -> (i32, i32) {
    %c0_i32 = arith.constant 0 : i32
    %c0_i32_0 = arith.constant 0 : i32
    %c0_i32_1 = arith.constant 0 : i32
    return %c0_i32, %c0_i32_0 : i32, i32
  }
  func.func @transform_4(%arg0: i32) -> (i32, i32) {
    %c0_i32 = arith.constant 0 : i32
    %c0_i32_0 = arith.constant 0 : i32
    %c0_i32_1 = arith.constant 0 : i32
    return %c0_i32, %c0_i32_0 : i32, i32
  }
  func.func @transform_5(%arg0: i32) -> (i32, i32) {
    %c0_i32 = arith.constant 0 : i32
    %c0_i32_0 = arith.constant 0 : i32
    %c0_i32_1 = arith.constant 0 : i32
    return %c0_i32, %c0_i32_0 : i32, i32
  }
  func.func @transform_6(%arg0: i32) -> (i32, i32) {
    %c0_i32 = arith.constant 0 : i32
    %c0_i32_0 = arith.constant 0 : i32
    %c0_i32_1 = arith.constant 0 : i32
    return %c0_i32, %c0_i32_0 : i32, i32
  }
  func.func @transform_7(%arg0: i32) -> (i32, i32) {
    %c0_i32 = arith.constant 0 : i32
    %c0_i32_0 = arith.constant 0 : i32
    %c0_i32_1 = arith.constant 0 : i32
    return %c0_i32, %c0_i32_0 : i32, i32
  }
  func.func @transform_8(%arg0: i32) -> (i32, i32) {
    %c0_i32 = arith.constant 0 : i32
    %c0_i32_0 = arith.constant 0 : i32
    %c0_i32_1 = arith.constant 0 : i32
    return %c0_i32, %c0_i32_0 : i32, i32
  }
  func.func @transform_9(%arg0: i32) -> (i32, i32) {
    %c0_i32 = arith.constant 0 : i32
    %c0_i32_0 = arith.constant 0 : i32
    %c0_i32_1 = arith.constant 0 : i32
    return %c0_i32, %c0_i32_0 : i32, i32
  }
  func.func @transform_10(%arg0: i32) -> (i32, i32) {
    %c0_i32 = arith.constant 0 : i32
    %c0_i32_0 = arith.constant 0 : i32
    %c0_i32_1 = arith.constant 0 : i32
    return %c0_i32, %c0_i32_0 : i32, i32
  }
  func.func @transform_11(%arg0: i32) -> (i32, i32) {
    %c0_i32 = arith.constant 0 : i32
    %c0_i32_0 = arith.constant 0 : i32
    %c0_i32_1 = arith.constant 0 : i32
    return %c0_i32, %c0_i32_0 : i32, i32
  }
  func.func @transform_12(%arg0: i32) -> (i32, i32) {
    %c0_i32 = arith.constant 0 : i32
    %c0_i32_0 = arith.constant 0 : i32
    %c0_i32_1 = arith.constant 0 : i32
    return %c0_i32, %c0_i32_0 : i32, i32
  }
  func.func @transform_13(%arg0: i32) -> (i32, i32) {
    %c0_i32 = arith.constant 0 : i32
    %c0_i32_0 = arith.constant 0 : i32
    %c0_i32_1 = arith.constant 0 : i32
    return %c0_i32, %c0_i32_0 : i32, i32
  }
  func.func @transform_14(%arg0: i32) -> (i32, i32) {
    %c0_i32 = arith.constant 0 : i32
    %c0_i32_0 = arith.constant 0 : i32
    %c0_i32_1 = arith.constant 0 : i32
    return %c0_i32, %c0_i32_0 : i32, i32
  }
  func.func @transform_15(%arg0: i32) -> (i32, i32) {
    %c0_i32 = arith.constant 0 : i32
    %c0_i32_0 = arith.constant 0 : i32
    %c0_i32_1 = arith.constant 0 : i32
    return %c0_i32, %c0_i32_0 : i32, i32
  }
  func.func @transform_16(%arg0: i32) -> (i32, i32) {
    %c0_i32 = arith.constant 0 : i32
    %c0_i32_0 = arith.constant 0 : i32
    %c0_i32_1 = arith.constant 0 : i32
    return %c0_i32, %c0_i32_0 : i32, i32
  }
  func.func @transform_17(%arg0: i32) -> (i32, i32) {
    %c0_i32 = arith.constant 0 : i32
    %c0_i32_0 = arith.constant 0 : i32
    return %arg0, %c0_i32 : i32, i32
  }
}

</mosaic_0001>

<bundles_post_ra>
// kernel: generator_forward.1
= control target key start
LH: loop header
LB: loop body
LE: loop exit
PB: predicated region body
PF: predicated region fallthrough
CT: control target
= control target key end

     0   :  { %s2132_s0 = inlined_call_operand.vmem [shape: f32[8,128], index: 0, kind: input, shape index: {}]   ;;  %s2133_s1 = inlined_call_operand.hbm [shape: f32[128,256], index: 1, kind: input, shape index: {}]   ;;  %s2134_s2 = inlined_call_operand.vmem [shape: f32[1,256], index: 2, kind: input, shape index: {}]   ;;  %s2135_s3 = inlined_call_operand.hbm [shape: f32[256,256], index: 3, kind: input, shape index: {}]   ;;  %s2136_s4 = inlined_call_operand.vmem [shape: f32[1,256], index: 4, kind: input, shape index: {}]   ;;  %s2137_s5 = inlined_call_operand.hbm [shape: f32[256,128], index: 5, kind: input, shape index: {}]   ;;  %s2138_s6 = inlined_call_operand.vmem [shape: f32[1,128], index: 6, kind: input, shape index: {}]   ;;  %s2139_s7 = inlined_call_operand.hbm [shape: f32[128,128], index: 7, kind: input, shape index: {}]   ;;  %s2140_s8 = inlined_call_operand.vmem [shape: f32[1,128], index: 8, kind: input, shape index: {}]   ;;  %s2141_s9 = inlined_call_operand.hbm [shape: f32[128,128], index: 9, kind: input, shape index: {}]   ;;  %s2142_s10 = inlined_call_operand.vmem [shape: f32[1,128], index: 10, kind: input, shape index: {}]   ;;  %s2143_s11 = inlined_call_operand.hbm [shape: f32[128,128], index: 11, kind: input, shape index: {}]   ;;  %s2144_s12 = inlined_call_operand.vmem [shape: f32[1,128], index: 12, kind: input, shape index: {}]   ;;  %s2145_s13 = inlined_call_operand.hbm [shape: f32[128,128], index: 13, kind: input, shape index: {}]   ;;  %s2146_s14 = inlined_call_operand.vmem [shape: f32[1,128], index: 14, kind: input, shape index: {}]   ;;  %s2147_s15 = inlined_call_operand.hbm [shape: f32[128,128], index: 15, kind: input, shape index: {}]   ;;  %s2148_s16 = inlined_call_operand.vmem [shape: f32[1,128], index: 16, kind: input, shape index: {}]   ;;  %s2149_s17 = inlined_call_operand.hbm [shape: f32[8,128], index: 17, kind: output, shape index: {}]  }
   0x1   :  { %2153 = sst [smem:[#allocation23_spill]] %s2132_s0 }
   0x2   :  { %2154 = sst [smem:[#allocation24_spill]] %s2133_s1 }
   0x3   :  { %2155 = sst [smem:[#allocation25_spill]] %s2149_s17 }
   0x4   :  { %22 = vsyncpa [#allocation3], 0 }
   0x5   :  { %23 = vsyncpa [#allocation6], 0 }
   0x6   :  { %24 = vsyncpa [#allocation9], 0 }
   0x7   :  { %25 = vsyncpa [#allocation12], 0 }
   0x8   :  { %26 = vsyncpa [#allocation15], 0 }
   0x9   :  { %27 = vsyncpa [#allocation4], 0  ;;  %s1816_s24 = smov [#allocation5]   ;;  %s1606_s28 = scalar_lea.hbm %s2135_s3, 8192 }
   0xa   :  { %s49_s25 = sshll.u32 %s1816_s24, 4  ;;  %p1607_p0 = scmp.ne.s32.totalorder %s2135_s3, %s1606_s28  ;;  %s50_s25 = int_to_ptr.vmem [resolvable:$true] %s49_s25 }
   0xb   :  { %p1610_p1 = scmp.lt.u32.totalorder %s1606_s28, %s2135_s3 }
   0xd   :  { %p1612_p2 = pnand %p1610_p1, %p1607_p0 }
   0xf   :  { %1615 = shalt.err (!%p1612_p2)
}
  0x10   :  { %s1616_s19 = scalar_lea.vmem %s50_s25, 8192  ;;  %p1621_p4 = scmp.lt.s32.totalorder %s50_s25, %s50_s25 }
  0x11   :  { %p1617_p3 = scmp.ne.s32.totalorder %s50_s25, %s1616_s19  ;;  %p1622_p5 = scmp.lt.s32.totalorder %s1616_s19, %s1616_s19 }
  0x13   :  { %p1623_p6 = por %p1622_p5, %p1621_p4 }
  0x15   :  { %p1624_p7 = pnand %p1623_p6, %p1617_p3 }
  0x17   :  { %1627 = shalt.err (!%p1624_p7)
}
  0x18   :  { %s2152_s1 = smov 256   ;;  %s1818_s20 = smov 16  }
  0x19   :  { %55 = dma.hbm_to_vmem [thread:$0]  %s2135_s3, 8192, %s50_s25, [#allocation6], %s2152_s1, %s2152_s1, %s1818_s20  }
  0x1a   :  { %s1819_s23 = smov [#allocation8]   ;;  %s1820_s26 = smov [#allocation11]  }
  0x1b   :  { %s77_s24 = sshll.u32 %s1819_s23, 4  ;;  %s105_s27 = sshll.u32 %s1820_s26, 4  ;;  %s78_s24 = int_to_ptr.vmem [resolvable:$true] %s77_s24  ;;  %s106_s27 = int_to_ptr.vmem [resolvable:$true] %s105_s27 }
  0x1c   :  { %s1628_s0 = scalar_lea.hbm %s2139_s7, 2048 }
  0x1d   :  { %p1629_p8 = scmp.ne.s32.totalorder %s2139_s7, %s1628_s0  ;;  %p1632_p9 = scmp.lt.u32.totalorder %s1628_s0, %s2139_s7 }
  0x1f   :  { %p1634_p10 = pnand %p1632_p9, %p1629_p8 }
  0x21   :  { %1637 = shalt.err (!%p1634_p10)
}
  0x22   :  { %s1638_s3 = scalar_lea.vmem %s78_s24, 2048  ;;  %p1643_p12 = scmp.lt.s32.totalorder %s78_s24, %s78_s24 }
  0x23   :  { %p1639_p11 = scmp.ne.s32.totalorder %s78_s24, %s1638_s3  ;;  %p1644_p13 = scmp.lt.s32.totalorder %s1638_s3, %s1638_s3 }
  0x25   :  { %p1645_p0 = por %p1644_p13, %p1643_p12 }
  0x27   :  { %p1646_p1 = pnand %p1645_p0, %p1639_p11 }
  0x29   :  { %1649 = shalt.err (!%p1646_p1)
}
  0x2a   :  { %s1821_s25 = smov 128   ;;  %s1822_s21 = smov 8  }
  0x2b   :  { %83 = dma.hbm_to_vmem [thread:$0]  %s2139_s7, 2048, %s78_s24, [#allocation9], %s1821_s25, %s1821_s25, %s1822_s21  }
  0x2c   :  { %s1650_s28 = scalar_lea.hbm %s2143_s11, 2048 }
  0x2d   :  { %p1651_p2 = scmp.ne.s32.totalorder %s2143_s11, %s1650_s28  ;;  %p1654_p3 = scmp.lt.u32.totalorder %s1650_s28, %s2143_s11 }
  0x2f   :  { %p1656_p4 = pnand %p1654_p3, %p1651_p2 }
  0x31   :  { %1659 = shalt.err (!%p1656_p4)
}
  0x32   :  { %s1660_s19 = scalar_lea.vmem %s106_s27, 2048  ;;  %p1665_p6 = scmp.lt.s32.totalorder %s106_s27, %s106_s27 }
  0x33   :  { %p1661_p5 = scmp.ne.s32.totalorder %s106_s27, %s1660_s19  ;;  %p1666_p7 = scmp.lt.s32.totalorder %s1660_s19, %s1660_s19 }
  0x35   :  { %p1667_p8 = por %p1666_p7, %p1665_p6 }
  0x37   :  { %p1668_p9 = pnand %p1667_p8, %p1661_p5 }
  0x39   :  { %1671 = shalt.err (!%p1668_p9)
}
  0x3a   :  { %111 = dma.hbm_to_vmem [thread:$0]  %s2143_s11, 2048, %s106_s27, [#allocation12], %s1821_s25, %s1821_s25, %s1822_s21  }
  0x3b   :  { %s1823_s3 = smov [#allocation2]   ;;  %s1824_s23 = smov [#allocation7]  }
  0x3c   :  { %s35_s22 = sshll.u32 %s1823_s3, 4  ;;  %s63_s17 = sshll.u32 %s1824_s23, 4  ;;  %s36_s22 = int_to_ptr.vmem [resolvable:$true] %s35_s22  ;;  %s64_s17 = int_to_ptr.vmem [resolvable:$true] %s63_s17 }
  0x3d   :  { %s2156_s29 = sld [smem:[#allocation24_spill]] }
  0x43   :  { %s1672_s0 = scalar_lea.hbm %s2156_s29, 4096 }
  0x44   :  { %p1673_p10 = scmp.ne.s32.totalorder %s2156_s29, %s1672_s0  ;;  %p1676_p11 = scmp.lt.u32.totalorder %s1672_s0, %s2156_s29 }
  0x46   :  { %p1678_p12 = pnand %p1676_p11, %p1673_p10 }
  0x48   :  { %1681 = shalt.err (!%p1678_p12)
}
  0x49   :  { %s1682_s11 = scalar_lea.vmem %s36_s22, 4096  ;;  %p1687_p0 = scmp.lt.s32.totalorder %s36_s22, %s36_s22 }
  0x4a   :  { %p1683_p13 = scmp.ne.s32.totalorder %s36_s22, %s1682_s11  ;;  %p1688_p1 = scmp.lt.s32.totalorder %s1682_s11, %s1682_s11 }
  0x4c   :  { %p1689_p2 = por %p1688_p1, %p1687_p0 }
  0x4e   :  { %p1690_p3 = pnand %p1689_p2, %p1683_p13 }
  0x50   :  { %1693 = shalt.err (!%p1690_p3)
}
  0x51   :  { %s2157_s27 = smov 256   ;;  %s1694_s23 = scalar_lea.hbm %s2137_s5, 4096 }
  0x52   :  { %41 = dma.hbm_to_vmem [thread:$0]  %s2156_s29, 4096, %s36_s22, [#allocation3], %s2157_s27, %s2157_s27, %s1818_s20  }
  0x53   :  { %p1695_p4 = scmp.ne.s32.totalorder %s2137_s5, %s1694_s23  ;;  %p1698_p5 = scmp.lt.u32.totalorder %s1694_s23, %s2137_s5 }
  0x55   :  { %p1700_p6 = pnand %p1698_p5, %p1695_p4 }
  0x57   :  { %1703 = shalt.err (!%p1700_p6)
}
  0x58   :  { %s1704_s18 = scalar_lea.vmem %s64_s17, 4096  ;;  %p1709_p8 = scmp.lt.s32.totalorder %s64_s17, %s64_s17 }
  0x59   :  { %p1705_p7 = scmp.ne.s32.totalorder %s64_s17, %s1704_s18  ;;  %p1710_p9 = scmp.lt.s32.totalorder %s1704_s18, %s1704_s18 }
  0x5b   :  { %p1711_p10 = por %p1710_p9, %p1709_p8 }
  0x5d   :  { %p1712_p11 = pnand %p1711_p10, %p1705_p7 }
  0x5f   :  { %1715 = shalt.err (!%p1712_p11)
}
  0x60   :  { %69 = dma.hbm_to_vmem [thread:$0]  %s2137_s5, 4096, %s64_s17, [#allocation6], %s1821_s25, %s1821_s25, %s1822_s21  }
  0x61   :  { %s1825_s29 = smov [#allocation10]   ;;  %s1826_s11 = smov [#allocation13]  }
  0x62   :  { %s91_s19 = sshll.u32 %s1825_s29, 4  ;;  %s119_s27 = sshll.u32 %s1826_s11, 4  ;;  %s92_s19 = int_to_ptr.vmem [resolvable:$true] %s91_s19  ;;  %s120_s27 = int_to_ptr.vmem [resolvable:$true] %s119_s27 }
  0x63   :  { %s1716_s3 = scalar_lea.hbm %s2141_s9, 2048 }
  0x64   :  { %p1717_p12 = scmp.ne.s32.totalorder %s2141_s9, %s1716_s3  ;;  %p1720_p13 = scmp.lt.u32.totalorder %s1716_s3, %s2141_s9 }
  0x66   :  { %p1722_p0 = pnand %p1720_p13, %p1717_p12 }
  0x68   :  { %1725 = shalt.err (!%p1722_p0)
}
  0x69   :  { %s1726_s5 = scalar_lea.vmem %s92_s19, 2048  ;;  %p1731_p2 = scmp.lt.s32.totalorder %s92_s19, %s92_s19 }
  0x6a   :  { %p1727_p1 = scmp.ne.s32.totalorder %s92_s19, %s1726_s5  ;;  %p1732_p3 = scmp.lt.s32.totalorder %s1726_s5, %s1726_s5 }
  0x6c   :  { %p1733_p4 = por %p1732_p3, %p1731_p2 }
  0x6e   :  { %p1734_p5 = pnand %p1733_p4, %p1727_p1 }
  0x70   :  { %1737 = shalt.err (!%p1734_p5)
}
  0x71   :  { %97 = dma.hbm_to_vmem [thread:$0]  %s2141_s9, 2048, %s92_s19, [#allocation9], %s1821_s25, %s1821_s25, %s1822_s21  }
  0x72   :  { %s1738_s20 = scalar_lea.hbm %s2145_s13, 2048 }
  0x73   :  { %p1739_p6 = scmp.ne.s32.totalorder %s2145_s13, %s1738_s20  ;;  %p1742_p7 = scmp.lt.u32.totalorder %s1738_s20, %s2145_s13 }
  0x75   :  { %p1744_p8 = pnand %p1742_p7, %p1739_p6 }
  0x77   :  { %1747 = shalt.err (!%p1744_p8)
}
  0x78   :  { %s1748_s24 = scalar_lea.vmem %s120_s27, 2048  ;;  %p1753_p10 = scmp.lt.s32.totalorder %s120_s27, %s120_s27 }
  0x79   :  { %p1749_p9 = scmp.ne.s32.totalorder %s120_s27, %s1748_s24  ;;  %p1754_p11 = scmp.lt.s32.totalorder %s1748_s24, %s1748_s24 }
  0x7b   :  { %p1755_p12 = por %p1754_p11, %p1753_p10 }
  0x7d   :  { %p1756_p13 = pnand %p1755_p12, %p1749_p9 }
  0x7f   :  { %1759 = shalt.err (!%p1756_p13)
}
  0x80   :  { %125 = dma.hbm_to_vmem [thread:$0]  %s2145_s13, 2048, %s120_s27, [#allocation12], %s1821_s25, %s1821_s25, %s1822_s21  }
  0x81   :  { %s1827_s3 = smov [#allocation14]   ;;  %s1760_s28 = scalar_lea.hbm %s2147_s15, 2048 }
  0x82   :  { %s133_s1 = sshll.u32 %s1827_s3, 4  ;;  %p1761_p0 = scmp.ne.s32.totalorder %s2147_s15, %s1760_s28  ;;  %s134_s1 = int_to_ptr.vmem [resolvable:$true] %s133_s1 }
  0x83   :  { %p1764_p1 = scmp.lt.u32.totalorder %s1760_s28, %s2147_s15 }
  0x85   :  { %p1766_p2 = pnand %p1764_p1, %p1761_p0 }
  0x87   :  { %1769 = shalt.err (!%p1766_p2)
}
  0x88   :  { %s1770_s18 = scalar_lea.vmem %s134_s1, 2048  ;;  %p1775_p4 = scmp.lt.s32.totalorder %s134_s1, %s134_s1 }
  0x89   :  { %p1771_p3 = scmp.ne.s32.totalorder %s134_s1, %s1770_s18  ;;  %p1776_p5 = scmp.lt.s32.totalorder %s1770_s18, %s1770_s18 }
  0x8b   :  { %p1777_p6 = por %p1776_p5, %p1775_p4 }
  0x8d   :  { %p1778_p7 = pnand %p1777_p6, %p1771_p3 }
  0x8f   :  { %1781 = shalt.err (!%p1778_p7)
}
  0x90   :  { %139 = dma.hbm_to_vmem [thread:$0]  %s2147_s15, 2048, %s134_s1, [#allocation15], %s1821_s25, %s1821_s25, %s1822_s21  }
  0x91   :  { %1804 = dma.done.wait [#allocation3], 4096  }
  0x92   :  { %1805 = vsyncadd [#allocation3], 4294963200 }
  0x93   :  { %1806 = dma.done.wait [#allocation6], 12288  }
  0x94   :  { %1807 = vsyncadd [#allocation6], 4294955008 }
  0x95   :  { %1808 = dma.done.wait [#allocation9], 4096  }
  0x96   :  { %1809 = vsyncadd [#allocation9], 4294963200 }
  0x97   :  { %1810 = dma.done.wait [#allocation12], 4096  }
  0x98   :  { %1811 = vsyncadd [#allocation12], 4294963200 }
  0x99   :  { %1812 = dma.done.wait [#allocation15], 2048  }
  0x9a   :  { %1813 = vsyncadd [#allocation15], 4294965248  ;;  %v1828_v0 = vmov 0.0   ;;  %v168_v1 = vld [vmem:[#allocation2 + $0x8] sm:$0xff]  ;;  %v170_v2 = vld [vmem:[#allocation2 + $0x18] sm:$0xff]  ;;  %s2158_s21 = sld [smem:[#allocation23_spill]] }
  0x9b   :  { %275 = vmatprep.mubr.f32.mxu0 %v1828_v0  ;;  %v167_v3 = vld [vmem:[#allocation2] sm:$0xff]  ;;  %v1342_v4 = vpack.c.bf16 %v170_v2, %v168_v1  ;;  %v169_v5 = vld [vmem:[#allocation2 + $0x10] sm:$0xff]  ;;  %v172_v6 = vld [vmem:[#allocation2 + $0x28] sm:$0xff]  ;;  %vm1830_vm0 = vmmov 0   ;;  %s1831_s23 = smov [#allocation16]  }
  0x9c   :  { %v174_v7 = vld [vmem:[#allocation2 + $0x38] sm:$0xff]  ;;  %v1344_v8 = vpack.c.bf16 %v169_v5, %v167_v3  ;;  %v171_v10 = vld [vmem:[#allocation2 + $0x20] sm:$0xff]  ;;  %v173_v11 = vld [vmem:[#allocation2 + $0x30] sm:$0xff]  ;;  %s1028_s26 = sshll.u32 %s1831_s23, 4  ;;  %s1029_s26 = int_to_ptr.vmem [resolvable:$true] %s1028_s26 }
  0x9d   :  { %v1346_v9 = vpack.c.bf16 %v174_v7, %v172_v6  ;;  %v176_v12 = vld [vmem:[#allocation2 + $0x48] sm:$0xff]  ;;  %1343 = vmatprep.subr.bf16.mxu0 %v1342_v4  ;;  %v178_v13 = vld [vmem:[#allocation2 + $0x58] sm:$0xff]  ;;  %v1348_v14 = vpack.c.bf16 %v173_v11, %v171_v10  ;;  %v175_v16 = vld [vmem:[#allocation2 + $0x40] sm:$0xff]  ;;  %s1782_s28 = scalar_lea.vmem %s1029_s26, 128  ;;  %p1787_p9 = scmp.lt.s32.totalorder %s1029_s26, %s1029_s26 }
  0x9e   :  { %1345 = vmatpush1.bf16.msra.mxu0 %v1344_v8  ;;  %v1350_v15 = vpack.c.bf16 %v178_v13, %v176_v12  ;;  %v177_v17 = vld [vmem:[#allocation2 + $0x50] sm:$0xff]  ;;  %v180_v18 = vld [vmem:[#allocation2 + $0x68] sm:$0xff]  ;;  %v182_v19 = vld [vmem:[#allocation2 + $0x78] sm:$0xff]  ;;  %p1783_p8 = scmp.ne.s32.totalorder %s1029_s26, %s1782_s28  ;;  %p1788_p10 = scmp.lt.s32.totalorder %s1782_s28, %s1782_s28 }
  0x9f   :  { %1347 = vmatprep.subr.bf16.mxu0 %v1346_v9  ;;  %v1352_v20 = vpack.c.bf16 %v177_v17, %v175_v16  ;;  %v1354_v21 = vpack.c.bf16 %v182_v19, %v180_v18  ;;  %v179_v22 = vld [vmem:[#allocation2 + $0x60] sm:$0xff]  ;;  %v181_v23 = vld [vmem:[#allocation2 + $0x70] sm:$0xff]  ;;  %v184_v24 = vld [vmem:[#allocation2 + $0x88] sm:$0xff] }
  0xa0   :  { %v186_v25 = vld [vmem:[#allocation2 + $0x98] sm:$0xff]  ;;  %v183_v26 = vld [vmem:[#allocation2 + $0x80] sm:$0xff]  ;;  %v185_v27 = vld [vmem:[#allocation2 + $0x90] sm:$0xff]  ;;  %v1356_v31 = vpack.c.bf16 %v181_v23, %v179_v22  ;;  %p1789_p11 = por %p1788_p10, %p1787_p9 }
  0xa1   :  { %v287_v28 = vld [vmem:[#allocation5 + $0x8] sm:$0xff]  ;;  %v289_v29 = vld [vmem:[#allocation5 + $0x18] sm:$0xff]  ;;  %v286_v30 = vld [vmem:[#allocation5] sm:$0xff]  ;;  %v1358_v36 = vpack.c.bf16 %v186_v25, %v184_v24  ;;  %v1360_v46 = vpack.c.bf16 %v185_v27, %v183_v26 }
  0xa2   :  { %1349 = vmatpush1.bf16.msra.mxu0 %v1348_v14  ;;  %v1374_v32 = vpack.c.bf16 %v289_v29, %v287_v28  ;;  %v288_v33 = vld [vmem:[#allocation5 + $0x10] sm:$0xff]  ;;  %v291_v34 = vld [vmem:[#allocation5 + $0x28] sm:$0xff]  ;;  %v293_v35 = vld [vmem:[#allocation5 + $0x38] sm:$0xff]  ;;  %p1790_p12 = pnand %p1789_p11, %p1783_p8 }
  0xa3   :  { %1351 = vmatprep.subr.bf16.mxu0 %v1350_v15  ;;  %v1376_v37 = vpack.c.bf16 %v288_v33, %v286_v30  ;;  %v1378_v38 = vpack.c.bf16 %v293_v35, %v291_v34  ;;  %v290_v39 = vld [vmem:[#allocation5 + $0x20] sm:$0xff]  ;;  %v292_v40 = vld [vmem:[#allocation5 + $0x30] sm:$0xff]  ;;  %v295_v41 = vld [vmem:[#allocation5 + $0x48] sm:$0xff] }
  0xa4   :  { %v188_v42 = vld [vmem:[#allocation2 + $0xa8] sm:$0xff]  ;;  %v190_v43 = vld [vmem:[#allocation2 + $0xb8] sm:$0xff]  ;;  %1375 = vmatprep.subr.bf16.mxu1 %v1374_v32  ;;  %v1380_v45 = vpack.c.bf16 %v292_v40, %v290_v39  ;;  %v187_v47 = vld [vmem:[#allocation2 + $0xa0] sm:$0xff] }
  0xa5   :  { %v297_v44 = vld [vmem:[#allocation5 + $0x58] sm:$0xff]  ;;  %1377 = vmatpush1.bf16.msra.mxu1 %v1376_v37  ;;  %v294_v49 = vld [vmem:[#allocation5 + $0x40] sm:$0xff]  ;;  %v296_v50 = vld [vmem:[#allocation5 + $0x50] sm:$0xff]  ;;  %v1362_v51 = vpack.c.bf16 %v190_v43, %v188_v42 }
  0xa6   :  { %1353 = vmatpush1.bf16.msra.mxu0 %v1352_v20  ;;  %1379 = vmatprep.subr.bf16.mxu1 %v1378_v38  ;;  %v1382_v48 = vpack.c.bf16 %v297_v44, %v295_v41  ;;  %v189_v52 = vld [vmem:[#allocation2 + $0xb0] sm:$0xff]  ;;  %v299_v53 = vld [vmem:[#allocation5 + $0x68] sm:$0xff]  ;;  %v301_v54 = vld [vmem:[#allocation5 + $0x78] sm:$0xff]  ;;  %v1384_v57 = vpack.c.bf16 %v296_v50, %v294_v49 }
  0xa7   :  { %1355 = vmatprep.subr.bf16.mxu0 %v1354_v21  ;;  %v192_v55 = vld [vmem:[#allocation2 + $0xc8] sm:$0xff]  ;;  %v194_v56 = vld [vmem:[#allocation2 + $0xd8] sm:$0xff]  ;;  %v1364_v58 = vpack.c.bf16 %v189_v52, %v187_v47  ;;  %v191_v59 = vld [vmem:[#allocation2 + $0xc0] sm:$0xff]  ;;  %v1386_v60 = vpack.c.bf16 %v301_v54, %v299_v53 }
  0xa8   :  { %v298_v61 = vld [vmem:[#allocation5 + $0x60] sm:$0xff]  ;;  %v300_v62 = vld [vmem:[#allocation5 + $0x70] sm:$0xff]  ;;  %v1366_v63 = vpack.c.bf16 %v194_v56, %v192_v55  ;;  %v303_v2 = vld [vmem:[#allocation5 + $0x88] sm:$0xff] }
  0xa9   :  { %1381 = vmatpush1.bf16.msra.mxu1 %v1380_v45  ;;  %v193_v1 = vld [vmem:[#allocation2 + $0xd0] sm:$0xff]  ;;  %v305_v3 = vld [vmem:[#allocation5 + $0x98] sm:$0xff]  ;;  %v196_v4 = vld [vmem:[#allocation2 + $0xe8] sm:$0xff]  ;;  %v1388_v6 = vpack.c.bf16 %v300_v62, %v298_v61 }
  0xaa   :  { %1357 = vmatpush1.bf16.msra.mxu0 %v1356_v31  ;;  %1383 = vmatprep.subr.bf16.mxu1 %v1382_v48  ;;  %v198_v5 = vld [vmem:[#allocation2 + $0xf8] sm:$0xff]  ;;  %v1368_v7 = vpack.c.bf16 %v193_v1, %v191_v59  ;;  %v195_v8 = vld [vmem:[#allocation2 + $0xe0] sm:$0xff]  ;;  %v1390_v9 = vpack.c.bf16 %v305_v3, %v303_v2  ;;  %v304_v11 = vld [vmem:[#allocation5 + $0x90] sm:$0xff] }
  0xab   :  { %1359 = vmatprep.subr.bf16.mxu0 %v1358_v36  ;;  %v302_v10 = vld [vmem:[#allocation5 + $0x80] sm:$0xff]  ;;  %v1370_v12 = vpack.c.bf16 %v198_v5, %v196_v4  ;;  %v197_v13 = vld [vmem:[#allocation2 + $0xf0] sm:$0xff]  ;;  %v307_v14 = vld [vmem:[#allocation5 + $0xa8] sm:$0xff] }
  0xac   :  { %v309_v15 = vld [vmem:[#allocation5 + $0xb8] sm:$0xff]  ;;  %v1392_v16 = vpack.c.bf16 %v304_v11, %v302_v10  ;;  %v1372_v17 = vpack.c.bf16 %v197_v13, %v195_v8  ;;  %v306_v19 = vld [vmem:[#allocation5 + $0xa0] sm:$0xff]  ;;  %v308_v20 = vld [vmem:[#allocation5 + $0xb0] sm:$0xff] }
  0xad   :  { %1385 = vmatpush1.bf16.msra.mxu1 %v1384_v57  ;;  %v1394_v18 = vpack.c.bf16 %v309_v15, %v307_v14  ;;  %v311_v21 = vld [vmem:[#allocation5 + $0xc8] sm:$0xff]  ;;  %v313_v22 = vld [vmem:[#allocation5 + $0xd8] sm:$0xff]  ;;  %v1396_v23 = vpack.c.bf16 %v308_v20, %v306_v19  ;;  %v166_v24 = vld [vmem:[%s2158_s21] sm:$0xff] }
  0xae   :  { %1361 = vmatpush1.bf16.msra.mxu0 %v1360_v46  ;;  %1387 = vmatprep.subr.bf16.mxu1 %v1386_v60  ;;  %v1398_v25 = vpack.c.bf16 %v313_v22, %v311_v21  ;;  %v310_v26 = vld [vmem:[#allocation5 + $0xc0] sm:$0xff]  ;;  %v312_v27 = vld [vmem:[#allocation5 + $0xd0] sm:$0xff]  ;;  %v315_v28 = vld [vmem:[#allocation5 + $0xe8] sm:$0xff] }
  0xaf   :  { %1363 = vmatprep.subr.bf16.mxu0 %v1362_v51  ;;  %v317_v29 = vld [vmem:[#allocation5 + $0xf8] sm:$0xff]  ;;  %v1400_v30 = vpack.c.bf16 %v312_v27, %v310_v26  ;;  %v314_v32 = vld [vmem:[#allocation5 + $0xe0] sm:$0xff]  ;;  %v316_v33 = vld [vmem:[#allocation5 + $0xf0] sm:$0xff] }
  0xb0   :  { %v1402_v31 = vpack.c.bf16 %v317_v29, %v315_v28  ;;  %v319_v34 = vld [vmem:[#allocation5 + $0x108] sm:$0xff]  ;;  %v321_v35 = vld [vmem:[#allocation5 + $0x118] sm:$0xff]  ;;  %v1404_v36 = vpack.c.bf16 %v316_v33, %v314_v32  ;;  %v318_v38 = vld [vmem:[#allocation5 + $0x100] sm:$0xff] }
  0xb1   :  { %1389 = vmatpush1.bf16.msra.mxu1 %v1388_v6  ;;  %v1406_v37 = vpack.c.bf16 %v321_v35, %v319_v34  ;;  %v320_v39 = vld [vmem:[#allocation5 + $0x110] sm:$0xff]  ;;  %v323_v40 = vld [vmem:[#allocation5 + $0x128] sm:$0xff]  ;;  %v325_v41 = vld [vmem:[#allocation5 + $0x138] sm:$0xff] }
  0xb2   :  { %1365 = vmatpush1.bf16.msra.mxu0 %v1364_v58  ;;  %1391 = vmatprep.subr.bf16.mxu1 %v1390_v9  ;;  %v1408_v42 = vpack.c.bf16 %v320_v39, %v318_v38  ;;  %v1410_v43 = vpack.c.bf16 %v325_v41, %v323_v40  ;;  %v322_v44 = vld [vmem:[#allocation5 + $0x120] sm:$0xff]  ;;  %v324_v45 = vld [vmem:[#allocation5 + $0x130] sm:$0xff]  ;;  %v327_v46 = vld [vmem:[#allocation5 + $0x148] sm:$0xff] }
  0xb3   :  { %1367 = vmatprep.subr.bf16.mxu0 %v1366_v63  ;;  %v329_v47 = vld [vmem:[#allocation5 + $0x158] sm:$0xff]  ;;  %v1412_v48 = vpack.c.bf16 %v324_v45, %v322_v44  ;;  %v326_v50 = vld [vmem:[#allocation5 + $0x140] sm:$0xff]  ;;  %v328_v51 = vld [vmem:[#allocation5 + $0x150] sm:$0xff] }
  0xb4   :  { %v1414_v49 = vpack.c.bf16 %v329_v47, %v327_v46  ;;  %v331_v52 = vld [vmem:[#allocation5 + $0x168] sm:$0xff]  ;;  %v333_v53 = vld [vmem:[#allocation5 + $0x178] sm:$0xff]  ;;  %v1416_v54 = vpack.c.bf16 %v328_v51, %v326_v50  ;;  %v330_v56 = vld [vmem:[#allocation5 + $0x160] sm:$0xff] }
  0xb5   :  { %1393 = vmatpush1.bf16.msra.mxu1 %v1392_v16  ;;  %v1418_v55 = vpack.c.bf16 %v333_v53, %v331_v52  ;;  %v332_v57 = vld [vmem:[#allocation5 + $0x170] sm:$0xff]  ;;  %v335_v58 = vld [vmem:[#allocation5 + $0x188] sm:$0xff]  ;;  %v337_v59 = vld [vmem:[#allocation5 + $0x198] sm:$0xff] }
  0xb6   :  { %1369 = vmatpush1.bf16.msra.mxu0 %v1368_v7  ;;  %1395 = vmatprep.subr.bf16.mxu1 %v1394_v18  ;;  %v1420_v60 = vpack.c.bf16 %v332_v57, %v330_v56  ;;  %v1422_v61 = vpack.c.bf16 %v337_v59, %v335_v58  ;;  %v334_v62 = vld [vmem:[#allocation5 + $0x180] sm:$0xff]  ;;  %v336_v63 = vld [vmem:[#allocation5 + $0x190] sm:$0xff]  ;;  %v339_v1 = vld [vmem:[#allocation5 + $0x1a8] sm:$0xff]  ;;  %v201_v56 = vlaneseq }
  0xb7   :  { %1371 = vmatprep.subr.bf16.mxu0 %v1370_v12  ;;  %v341_v2 = vld [vmem:[#allocation5 + $0x1b8] sm:$0xff]  ;;  %v1424_v3 = vpack.c.bf16 %v336_v63, %v334_v62  ;;  %v338_v5 = vld [vmem:[#allocation5 + $0x1a0] sm:$0xff]  ;;  %v340_v6 = vld [vmem:[#allocation5 + $0x1b0] sm:$0xff] }
  0xb8   :  { %v1426_v4 = vpack.c.bf16 %v341_v2, %v339_v1  ;;  %v1428_v7 = vpack.c.bf16 %v340_v6, %v338_v5  ;;  %v343_v8 = vld [vmem:[#allocation5 + $0x1c8] sm:$0xff]  ;;  %v345_v9 = vld [vmem:[#allocation5 + $0x1d8] sm:$0xff]  ;;  %v342_v11 = vld [vmem:[#allocation5 + $0x1c0] sm:$0xff]  ;;  %v202_v57 = vshrl.u32 %v201_v56, 7 }
  0xb9   :  { %1397 = vmatpush1.bf16.msra.mxu1 %v1396_v23  ;;  %v1430_v10 = vpack.c.bf16 %v345_v9, %v343_v8  ;;  %v344_v12 = vld [vmem:[#allocation5 + $0x1d0] sm:$0xff]  ;;  %v347_v14 = vld [vmem:[#allocation5 + $0x1e8] sm:$0xff]  ;;  %v349_v15 = vld [vmem:[#allocation5 + $0x1f8] sm:$0xff] }
  0xba   :  { %1373 = vmatpush1.bf16.msra.mxu0 %v1372_v17  ;;  %1399 = vmatprep.subr.bf16.mxu1 %v1398_v25  ;;  %v1432_v13 = vpack.c.bf16 %v344_v12, %v342_v11  ;;  %v1434_v16 = vpack.c.bf16 %v349_v15, %v347_v14  ;;  %v346_v17 = vld [vmem:[#allocation5 + $0x1e0] sm:$0xff]  ;;  %v348_v18 = vld [vmem:[#allocation5 + $0x1f0] sm:$0xff]  ;;  %v454_v21 = vld [vmem:[#allocation7 + $0x88] sm:$0xff]  ;;  %v203_v58 = vsub.s32 0, %v202_v57 }
  0xbb   :  { %v1436_v19 = vpack.c.bf16 %v348_v18, %v346_v17  ;;  %v453_v20 = vld [vmem:[#allocation7 + $0x80] sm:$0xff]  ;;  %v455_v25 = vld [vmem:[#allocation7 + $0x90] sm:$0xff]  ;;  %v456_v26 = vld [vmem:[#allocation7 + $0x98] sm:$0xff] }
  0xbc   :  { %v437_v22 = vld [vmem:[#allocation7] sm:$0xff]  ;;  %v1438_v23 = vpack.c.bf16 %v454_v21, %v453_v20  ;;  %v1442_v28 = vpack.c.bf16 %v456_v26, %v455_v25  ;;  %v439_v29 = vld [vmem:[#allocation7 + $0x10] sm:$0xff]  ;;  %v458_v32 = vld [vmem:[#allocation7 + $0xa8] sm:$0xff]  ;;  %v1829_v20 = vmov 0.0|0.0  }
  0xbd   :  { %276 = vmatmul.mubr.f32.vlgmr.msra.gmra.mrb[0].mxu0 %v166_v24  ;;  %1401 = vmatpush1.bf16.msra.mxu1 %v1400_v30  ;;  %v438_v24 = vld [vmem:[#allocation7 + $0x8] sm:$0xff]  ;;  %v440_v30 = vld [vmem:[#allocation7 + $0x18] sm:$0xff]  ;;  %v441_v35 = vld [vmem:[#allocation7 + $0x20] sm:$0xff] }
  0xbe   :  { %1403 = vmatprep.subr.bf16.mxu1 %v1402_v31  ;;  %v1440_v27 = vpack.c.bf16 %v438_v24, %v437_v22  ;;  %v457_v31 = vld [vmem:[#allocation7 + $0xa0] sm:$0xff]  ;;  %1439 = vmatprep.subr.bf16.mxu0 %v1438_v23  ;;  %v1444_v33 = vpack.c.bf16 %v440_v30, %v439_v29  ;;  %v460_v38 = vld [vmem:[#allocation7 + $0xb8] sm:$0xff]  ;;  %v443_v41 = vld [vmem:[#allocation7 + $0x30] sm:$0xff] }
  0xbf   :  { %v1446_v34 = vpack.c.bf16 %v458_v32, %v457_v31  ;;  %v462_v44 = vld [vmem:[#allocation7 + $0xc8] sm:$0xff]  ;;  %v445_v47 = vld [vmem:[#allocation7 + $0x40] sm:$0xff]  ;;  %v464_v50 = vld [vmem:[#allocation7 + $0xd8] sm:$0xff] }
  0xc0   :  { %1441 = vmatpush3.bf16.msra.mxu0 %v1440_v27  ;;  %v447_v53 = vld [vmem:[#allocation7 + $0x50] sm:$0xff]  ;;  %v199_v59 = vld [vmem:[%s2134_s2] sm:$0x3]  ;;  %v466_v9 = vld [vmem:[#allocation7 + $0xe8] sm:$0xff] }
  0xc1   :  { %1405 = vmatpush1.bf16.msra.mxu1 %v1404_v36  ;;  %1443 = vmatprep.subr.bf16.mxu0 %v1442_v28  ;;  %v442_v36 = vld [vmem:[#allocation7 + $0x28] sm:$0xff]  ;;  %v465_v8 = vld [vmem:[#allocation7 + $0xe0] sm:$0xff]  ;;  %v467_v14 = vld [vmem:[#allocation7 + $0xf0] sm:$0xff] }
  0xc2   :  { %1407 = vmatprep.subr.bf16.mxu1 %v1406_v37  ;;  %v459_v37 = vld [vmem:[#allocation7 + $0xb0] sm:$0xff]  ;;  %v1448_v39 = vpack.c.bf16 %v442_v36, %v441_v35  ;;  %v449_v11 = vld [vmem:[#allocation7 + $0x60] sm:$0xff]  ;;  %v450_v12 = vld [vmem:[#allocation7 + $0x68] sm:$0xff] }
  0xc3   :  { %v1450_v40 = vpack.c.bf16 %v460_v38, %v459_v37  ;;  %v468_v15 = vld [vmem:[#allocation7 + $0xf8] sm:$0xff]  ;;  %v451_v17 = vld [vmem:[#allocation7 + $0x70] sm:$0xff]  ;;  %v350_v21 = vld [vmem:[%s2136_s4] sm:$0x3] }
  0xc4   :  { %1445 = vmatpush3.bf16.msra.mxu0 %v1444_v33  ;;  %v452_v18 = vld [vmem:[#allocation7 + $0x78] sm:$0xff]  ;;  %v355_v22 = vrot.slane %v350_v21, %v203_v58  ;;  %v548_v29 = vld [vmem:[#allocation8] sm:$0xff]  ;;  %v549_v30 = vld [vmem:[#allocation8 + $0x8] sm:$0xff] }
  0xc5   :  { %1409 = vmatpush1.bf16.msra.mxu1 %v1408_v42  ;;  %1447 = vmatprep.subr.bf16.mxu0 %v1446_v34  ;;  %v444_v42 = vld [vmem:[#allocation7 + $0x38] sm:$0xff]  ;;  %v1471_v33 = vpack.c.bf16 %v549_v30, %v548_v29  ;;  %v550_v35 = vld [vmem:[#allocation8 + $0x10] sm:$0xff]  ;;  %v552_v38 = vld [vmem:[#allocation8 + $0x20] sm:$0xff] }
  0xc6   :  { %1411 = vmatprep.subr.bf16.mxu1 %v1410_v43  ;;  %v461_v43 = vld [vmem:[#allocation7 + $0xc0] sm:$0xff]  ;;  %v1452_v45 = vpack.c.bf16 %v444_v42, %v443_v41  ;;  %v551_v36 = vld [vmem:[#allocation8 + $0x18] sm:$0xff]  ;;  %v554_v41 = vld [vmem:[#allocation8 + $0x30] sm:$0xff] }
  0xc7   :  { %v1454_v46 = vpack.c.bf16 %v462_v44, %v461_v43  ;;  %v1474_v37 = vpack.c.bf16 %v551_v36, %v550_v35  ;;  %v555_v42 = vld [vmem:[#allocation8 + $0x38] sm:$0xff]  ;;  %v556_v44 = vld [vmem:[#allocation8 + $0x40] sm:$0xff] }
  0xc8   :  { %1449 = vmatpush3.bf16.msra.mxu0 %v1448_v39  ;;  %v553_v39 = vld [vmem:[#allocation8 + $0x28] sm:$0xff]  ;;  %v1480_v43 = vpack.c.bf16 %v555_v42, %v554_v41  ;;  %v643_v56 = vld [vmem:[#allocation10] sm:$0xff]  ;;  %v741_v29 = vld [vmem:[#allocation11 + $0x18] sm:$0xff] }
  0xc9   :  { %1413 = vmatpush1.bf16.msra.mxu1 %v1412_v48  ;;  %1451 = vmatprep.subr.bf16.mxu0 %v1450_v40  ;;  %v446_v48 = vld [vmem:[#allocation7 + $0x48] sm:$0xff]  ;;  %v1477_v40 = vpack.c.bf16 %v553_v39, %v552_v38  ;;  %v745_v35 = vld [vmem:[#allocation11 + $0x38] sm:$0xff] }
  0xca   :  { %1415 = vmatprep.subr.bf16.mxu1 %v1414_v49  ;;  %v463_v49 = vld [vmem:[#allocation7 + $0xd0] sm:$0xff]  ;;  %v1456_v51 = vpack.c.bf16 %v446_v48, %v445_v47  ;;  %v559_v48 = vld [vmem:[#allocation8 + $0x58] sm:$0xff]  ;;  %v747_v38 = vld [vmem:[#allocation11 + $0x48] sm:$0xff] }
  0xcb   :  { %v1458_v52 = vpack.c.bf16 %v464_v50, %v463_v49  ;;  %v558_v47 = vld [vmem:[#allocation8 + $0x50] sm:$0xff]  ;;  %v560_v50 = vld [vmem:[#allocation8 + $0x60] sm:$0xff]  ;;  %v749_v41 = vld [vmem:[#allocation11 + $0x58] sm:$0xff] }
  0xcc   :  { %1453 = vmatpush3.bf16.msra.mxu0 %v1452_v45  ;;  %v557_v45 = vld [vmem:[#allocation8 + $0x48] sm:$0xff]  ;;  %v1486_v49 = vpack.c.bf16 %v559_v48, %v558_v47 }
  0xcd   :  { %1417 = vmatpush1.bf16.msra.mxu1 %v1416_v54  ;;  %1455 = vmatprep.subr.bf16.mxu0 %v1454_v46  ;;  %v448_v54 = vld [vmem:[#allocation7 + $0x58] sm:$0xff]  ;;  %v1483_v46 = vpack.c.bf16 %v557_v45, %v556_v44 }
  0xce   :  { %1419 = vmatprep.subr.bf16.mxu1 %v1418_v55  ;;  %v1460_v55 = vpack.c.bf16 %v448_v54, %v447_v53  ;;  %v562_v53 = vld [vmem:[#allocation8 + $0x70] sm:$0xff]  ;;  %v563_v54 = vld [vmem:[#allocation8 + $0x78] sm:$0xff] }
  0xd0   :  { %1457 = vmatpush3.bf16.msra.mxu0 %v1456_v51  ;;  %v561_v51 = vld [vmem:[#allocation8 + $0x68] sm:$0xff] }
  0xd1   :  { %1421 = vmatpush1.bf16.msra.mxu1 %v1420_v60  ;;  %1459 = vmatprep.subr.bf16.mxu0 %v1458_v52  ;;  %v207_v60 = vsub.s32 1, %v202_v57  ;;  %v1489_v52 = vpack.c.bf16 %v561_v51, %v560_v50  ;;  %v644_v57 = vld [vmem:[#allocation10 + $0x8] sm:$0xff] }
  0xd2   :  { %1423 = vmatprep.subr.bf16.mxu1 %v1422_v61  ;;  %v204_v61 = vrot.slane %v199_v59, %v203_v58  ;;  %v645_v58 = vld [vmem:[#allocation10 + $0x10] sm:$0xff]  ;;  %v751_v50 = vld [vmem:[#allocation11 + $0x68] sm:$0xff] }
  0xd3   :  { %v208_v62 = vrot.slane %v199_v59, %v207_v60  ;;  %v359_v23 = vrot.slane %v350_v21, %v207_v60  ;;  %v1495_v59 = vpack.c.bf16 %v644_v57, %v643_v56  ;;  %v646_v60 = vld [vmem:[#allocation10 + $0x18] sm:$0xff]  ;;  %v834_v56 = vld [vmem:[#allocation13 + $0x8] sm:$0xff]  ;;  %v835_v57 = vld [vmem:[#allocation13 + $0x10] sm:$0xff] }
  0xd4   :  { %1461 = vmatpush3.bf16.msra.mxu0 %v1460_v55  ;;  %v1492_v55 = vpack.c.bf16 %v563_v54, %v562_v53  ;;  %v753_v53 = vld [vmem:[#allocation11 + $0x78] sm:$0xff] }
  0xd5   :  { %1425 = vmatpush1.bf16.msra.mxu1 %v1424_v3 }
  0xd6   :  { %1427 = vmatprep.subr.bf16.mxu1 %v1426_v4 }
  0xd9   :  { %1429 = vmatpush1.bf16.msra.mxu1 %v1428_v7 }
  0xda   :  { %1431 = vmatprep.subr.bf16.mxu1 %v1430_v10  ;;  %v1462_v10 = vpack.c.bf16 %v466_v9, %v465_v8  ;;  %v653_v8 = vld [vmem:[#allocation10 + $0x50] sm:$0xff]  ;;  %v654_v9 = vld [vmem:[#allocation10 + $0x58] sm:$0xff] }
  0xdc   :  { %1463 = vmatprep.subr.bf16.mxu0 %v1462_v10  ;;  %v1510_v10 = vpack.c.bf16 %v654_v9, %v653_v8  ;;  %v844_v8 = vld [vmem:[#allocation13 + $0x58] sm:$0xff] }
  0xdd   :  { %1433 = vmatpush1.bf16.msra.mxu1 %v1432_v13  ;;  %v1464_v13 = vpack.c.bf16 %v450_v12, %v449_v11  ;;  %v1041_v12 = vld [vmem:[%s2138_s6] ss:$0 sm:$0xff] }
  0xde   :  { %1435 = vmatprep.subr.bf16.mxu1 %v1434_v16  ;;  %v1466_v16 = vpack.c.bf16 %v468_v15, %v467_v14 }
  0xdf   :  { %1465 = vmatpush3.bf16.msra.mxu0 %v1464_v13 }
  0xe0   :  { %1467 = vmatprep.subr.bf16.mxu0 %v1466_v16 }
  0xe1   :  { %1437 = vmatpush1.bf16.msra.mxu1 %v1436_v19  ;;  %v1468_v19 = vpack.c.bf16 %v452_v18, %v451_v17  ;;  %v655_v18 = vld [vmem:[#allocation10 + $0x60] sm:$0xff] }
  0xe2   :  { %1494 = vmatprep.subr.bf16.mxu1 %v1829_v20 }
  0xe3   :  { %1469 = vmatpush3.bf16.msra.mxu0 %v1468_v19  ;;  %v656_v19 = vld [vmem:[#allocation10 + $0x68] sm:$0xff] }
  0xe4   :  { %1470 = vmatprep.subr.bf16.mxu0 %v1829_v20  ;;  %v1513_v21 = vpack.c.bf16 %v656_v19, %v655_v18  ;;  %v847_v19 = vld [vmem:[#allocation13 + $0x70] sm:$0xff] }
 0x190   :  { %v277_v63 = vpop.f32.mrb[0].mxu0 }
 0x191   :  { %v278_v1 = vadd.f32 %v277_v63, %v204_v61  ;;  %v279_v2 = vpop.f32.mrb[1].mxu0  ;;  %v1498_v61 = vpack.c.bf16 %v646_v60, %v645_v58  ;;  %v648_v63 = vld [vmem:[#allocation10 + $0x28] sm:$0xff] }
 0x192   :  { %v280_v3 = vadd.f32 %v279_v2, %v208_v62  ;;  %v647_v62 = vld [vmem:[#allocation10 + $0x20] sm:$0xff]  ;;  %v649_v2 = vld [vmem:[#allocation10 + $0x30] sm:$0xff] }
 0x193   :  { %v282_v4 = vmul.f32 0.01, %v278_v1 }
 0x194   :  { %v283_v5 = vmul.f32 0.01, %v280_v3 }
 0x195   :  { %v284_v7 = vmax.f32 %v278_v1, %v282_v4  ;;  %v1501_v1 = vpack.c.bf16 %v648_v63, %v647_v62  ;;  %v838_v62 = vld [vmem:[#allocation13 + $0x28] sm:$0xff] }
 0x196   :  { %v285_v6 = vmax.f32 %v280_v3, %v283_v5  ;;  %v650_v3 = vld [vmem:[#allocation10 + $0x38] sm:$0xff]  ;;  %v651_v5 = vld [vmem:[#allocation10 + $0x40] sm:$0xff] }
 0x197   :  { %v1504_v4 = vpack.c.bf16 %v650_v3, %v649_v2  ;;  %v840_v2 = vld [vmem:[#allocation13 + $0x38] sm:$0xff] }
 0x198   :  { %426 = vmatprep.mubr.f32.mxu1 %v285_v6  ;;  %v652_v6 = vld [vmem:[#allocation10 + $0x48] sm:$0xff] }
 0x199   :  { %427 = vmatmul.mubr.f32.vlgmr.msra.gmra.mrb[0].mxu1 %v284_v7  ;;  %v1507_v7 = vpack.c.bf16 %v652_v6, %v651_v5  ;;  %v842_v5 = vld [vmem:[#allocation13 + $0x48] sm:$0xff] }
 0x19a   :  { %1234 = vmatprep.mubr.msk.f32.mxu1 %vm1830_vm0, %v1828_v0  ;;  %1496 = vmatpush3.bf16.msra.mxu1 %v1495_v59  ;;  %v836_v59 = vld [vmem:[#allocation13 + $0x18] sm:$0xff] }
 0x19b   :  { %1497 = vmatprep.subr.bf16.mxu1 %v1829_v20  ;;  %v1546_v60 = vpack.c.bf16 %v836_v59, %v835_v57 }
 0x19e   :  { %1499 = vmatpush3.bf16.msra.mxu1 %v1498_v61  ;;  %v837_v61 = vld [vmem:[#allocation13 + $0x20] sm:$0xff] }
 0x19f   :  { %1500 = vmatprep.subr.bf16.mxu1 %v1829_v20  ;;  %v1549_v63 = vpack.c.bf16 %v838_v62, %v837_v61 }
 0x1a2   :  { %1502 = vmatpush3.bf16.msra.mxu1 %v1501_v1  ;;  %v839_v1 = vld [vmem:[#allocation13 + $0x30] sm:$0xff] }
 0x1a3   :  { %1503 = vmatprep.subr.bf16.mxu1 %v1829_v20  ;;  %v1552_v3 = vpack.c.bf16 %v840_v2, %v839_v1 }
 0x1a6   :  { %1505 = vmatpush3.bf16.msra.mxu1 %v1504_v4  ;;  %v841_v4 = vld [vmem:[#allocation13 + $0x40] sm:$0xff] }
 0x1a7   :  { %1506 = vmatprep.subr.bf16.mxu1 %v1829_v20  ;;  %v1555_v6 = vpack.c.bf16 %v842_v5, %v841_v4 }
 0x1aa   :  { %1508 = vmatpush3.bf16.msra.mxu1 %v1507_v7  ;;  %v843_v7 = vld [vmem:[#allocation13 + $0x50] sm:$0xff] }
 0x1ab   :  { %1509 = vmatprep.subr.bf16.mxu1 %v1829_v20  ;;  %v1558_v9 = vpack.c.bf16 %v844_v8, %v843_v7 }
 0x1ae   :  { %1511 = vmatpush3.bf16.msra.mxu1 %v1510_v10  ;;  %v1043_v10 = vld [vmem:[%s2142_s10] ss:$0 sm:$0xff] }
 0x1af   :  { %1512 = vmatprep.subr.bf16.mxu1 %v1829_v20 }
 0x1b2   :  { %1514 = vmatpush3.bf16.msra.mxu1 %v1513_v21  ;;  %v848_v21 = vld [vmem:[#allocation13 + $0x78] sm:$0xff] }
 0x1b3   :  { %1515 = vmatprep.subr.bf16.mxu1 %v1829_v20 }
 0x26c   :  { %v428_v24 = vpop.f32.mrb[0].mxu1 }
 0x26d   :  { %v429_v25 = vadd.f32 %v428_v24, %v355_v22  ;;  %v430_v26 = vpop.f32.mrb[1].mxu1  ;;  %v657_v22 = vld [vmem:[#allocation10 + $0x70] sm:$0xff] }
 0x26e   :  { %v431_v27 = vadd.f32 %v430_v26, %v359_v23  ;;  %v658_v23 = vld [vmem:[#allocation10 + $0x78] sm:$0xff]  ;;  %v739_v26 = vld [vmem:[#allocation11 + $0x8] sm:$0xff] }
 0x26f   :  { %v433_v28 = vmul.f32 0.01, %v429_v25  ;;  %v1516_v24 = vpack.c.bf16 %v658_v23, %v657_v22  ;;  %v1564_v22 = vpack.c.bf16 %v848_v21, %v847_v19  ;;  %v928_v23 = vld [vmem:[#allocation14] sm:$0xff] }
 0x270   :  { %v434_v31 = vmul.f32 0.01, %v431_v27 }
 0x271   :  { %v435_v34 = vmax.f32 %v429_v25, %v433_v28  ;;  %1517 = vmatpush3.bf16.msra.mxu1 %v1516_v24  ;;  %v738_v25 = vld [vmem:[#allocation11] sm:$0xff]  ;;  %v929_v24 = vld [vmem:[#allocation14 + $0x8] sm:$0xff] }
 0x272   :  { %v436_v32 = vmax.f32 %v431_v27, %v434_v31  ;;  %1542 = vmatprep.subr.bf16.mxu1 %v1829_v20  ;;  %v740_v27 = vld [vmem:[#allocation11 + $0x10] sm:$0xff]  ;;  %v1519_v28 = vpack.c.bf16 %v739_v26, %v738_v25  ;;  %v742_v31 = vld [vmem:[#allocation11 + $0x20] sm:$0xff]  ;;  %v1567_v26 = vpack.c.bf16 %v929_v24, %v928_v23 }
 0x273   :  { %v1522_v30 = vpack.c.bf16 %v741_v29, %v740_v27  ;;  %v930_v25 = vld [vmem:[#allocation14 + $0x10] sm:$0xff]  ;;  %v931_v27 = vld [vmem:[#allocation14 + $0x18] sm:$0xff]  ;;  %v933_v29 = vld [vmem:[#allocation14 + $0x28] sm:$0xff] }
 0x274   :  { %540 = vmatprep.mubr.f32.mxu0 %v436_v32  ;;  %v743_v32 = vld [vmem:[#allocation11 + $0x28] sm:$0xff] }
 0x275   :  { %541 = vmatmul.mubr.f32.vlgmr.msra.gmra.mrb[2].mxu0 %v435_v34  ;;  %v744_v34 = vld [vmem:[#allocation11 + $0x30] sm:$0xff] }
 0x276   :  { %1472 = vmatpush3.bf16.msra.mxu0 %v1471_v33  ;;  %1199 = vmatprep.mubr.msk.f32.mxu0 %vm1830_vm0, %v1828_v0  ;;  %v1525_v33 = vpack.c.bf16 %v743_v32, %v742_v31  ;;  %v1528_v36 = vpack.c.bf16 %v745_v35, %v744_v34  ;;  %v934_v31 = vld [vmem:[#allocation14 + $0x30] sm:$0xff]  ;;  %v935_v32 = vld [vmem:[#allocation14 + $0x38] sm:$0xff]  ;;  %v936_v34 = vld [vmem:[#allocation14 + $0x40] sm:$0xff] }
 0x277   :  { %1473 = vmatprep.subr.bf16.mxu0 %v1829_v20  ;;  %v937_v35 = vld [vmem:[#allocation14 + $0x48] sm:$0xff] }
 0x27a   :  { %1475 = vmatpush3.bf16.msra.mxu0 %v1474_v37  ;;  %v746_v37 = vld [vmem:[#allocation11 + $0x40] sm:$0xff] }
 0x27b   :  { %1476 = vmatprep.subr.bf16.mxu0 %v1829_v20  ;;  %v1531_v39 = vpack.c.bf16 %v747_v38, %v746_v37  ;;  %v938_v37 = vld [vmem:[#allocation14 + $0x50] sm:$0xff]  ;;  %v939_v38 = vld [vmem:[#allocation14 + $0x58] sm:$0xff] }
 0x27e   :  { %1478 = vmatpush3.bf16.msra.mxu0 %v1477_v40  ;;  %v748_v40 = vld [vmem:[#allocation11 + $0x50] sm:$0xff] }
 0x27f   :  { %1479 = vmatprep.subr.bf16.mxu0 %v1829_v20  ;;  %v1534_v42 = vpack.c.bf16 %v749_v41, %v748_v40  ;;  %v1044_v40 = vld [vmem:[%s2144_s12] ss:$0 sm:$0xff] }
 0x282   :  { %1481 = vmatpush3.bf16.msra.mxu0 %v1480_v43  ;;  %v1042_v43 = vld [vmem:[%s2140_s8] ss:$0 sm:$0xff] }
 0x283   :  { %1482 = vmatprep.subr.bf16.mxu0 %v1829_v20 }
 0x286   :  { %1484 = vmatpush3.bf16.msra.mxu0 %v1483_v46 }
 0x287   :  { %1485 = vmatprep.subr.bf16.mxu0 %v1829_v20 }
 0x28a   :  { %1487 = vmatpush3.bf16.msra.mxu0 %v1486_v49  ;;  %v750_v49 = vld [vmem:[#allocation11 + $0x60] sm:$0xff] }
 0x28b   :  { %1488 = vmatprep.subr.bf16.mxu0 %v1829_v20  ;;  %v1537_v51 = vpack.c.bf16 %v751_v50, %v750_v49  ;;  %v942_v49 = vld [vmem:[#allocation14 + $0x70] sm:$0xff]  ;;  %v943_v50 = vld [vmem:[#allocation14 + $0x78] sm:$0xff] }
 0x28e   :  { %1490 = vmatpush3.bf16.msra.mxu0 %v1489_v52  ;;  %v752_v52 = vld [vmem:[#allocation11 + $0x70] sm:$0xff] }
 0x28f   :  { %1491 = vmatprep.subr.bf16.mxu0 %v1829_v20  ;;  %v1540_v54 = vpack.c.bf16 %v753_v53, %v752_v52  ;;  %v1045_v52 = vld [vmem:[%s2146_s14] ss:$0 sm:$0xff] }
 0x292   :  { %1493 = vmatpush3.bf16.msra.mxu0 %v1492_v55  ;;  %v833_v55 = vld [vmem:[#allocation13] sm:$0xff] }
 0x293   :  { %1518 = vmatprep.subr.bf16.mxu0 %v1829_v20  ;;  %v1543_v58 = vpack.c.bf16 %v834_v56, %v833_v55 }
 0x348   :  { %v1079_v11 = vpop.f32.mrb[2].mxu0 }
 0x349   :  { %v1080_v13 = vpop.f32.mrb[3].mxu0 }
 0x34a   :  { %v1081_v14 = vadd.f32 %v1080_v13, %v1079_v11 }
 0x34c   :  { %v543_v15 = vadd.f32 %v1081_v14, %v1041_v12 }
 0x34e   :  { %v546_v16 = vmul.f32 0.01, %v543_v15 }
 0x350   :  { %v547_v17 = vmax.f32 %v543_v15, %v546_v16  ;;  %v845_v16 = vld [vmem:[#allocation13 + $0x60] sm:$0xff] }
 0x352   :  { %1200 = vmatmul.mubr.f32.vlgmr.msra.gmra.mrb[4].mxu0 %v547_v17  ;;  %v846_v17 = vld [vmem:[#allocation13 + $0x68] sm:$0xff] }
 0x353   :  { %1269 = vmatprep.mubr.msk.f32.mxu0 %vm1830_vm0, %v1828_v0  ;;  %1520 = vmatpush3.bf16.msra.mxu0 %v1519_v28  ;;  %v1561_v18 = vpack.c.bf16 %v846_v17, %v845_v16  ;;  %v1570_v28 = vpack.c.bf16 %v931_v27, %v930_v25 }
 0x354   :  { %1521 = vmatprep.subr.bf16.mxu0 %v1829_v20 }
 0x357   :  { %1523 = vmatpush3.bf16.msra.mxu0 %v1522_v30 }
 0x358   :  { %1524 = vmatprep.subr.bf16.mxu0 %v1829_v20 }
 0x35b   :  { %1526 = vmatpush3.bf16.msra.mxu0 %v1525_v33  ;;  %v1576_v33 = vpack.c.bf16 %v935_v32, %v934_v31 }
 0x35c   :  { %1527 = vmatprep.subr.bf16.mxu0 %v1829_v20 }
 0x35f   :  { %1529 = vmatpush3.bf16.msra.mxu0 %v1528_v36  ;;  %v1579_v36 = vpack.c.bf16 %v937_v35, %v936_v34 }
 0x360   :  { %1530 = vmatprep.subr.bf16.mxu0 %v1829_v20 }
 0x363   :  { %1532 = vmatpush3.bf16.msra.mxu0 %v1531_v39  ;;  %v1582_v39 = vpack.c.bf16 %v939_v38, %v938_v37 }
 0x364   :  { %1533 = vmatprep.subr.bf16.mxu0 %v1829_v20 }
 0x367   :  { %1535 = vmatpush3.bf16.msra.mxu0 %v1534_v42 }
 0x368   :  { %1536 = vmatprep.subr.bf16.mxu0 %v1829_v20 }
 0x36b   :  { %1538 = vmatpush3.bf16.msra.mxu0 %v1537_v51  ;;  %v1588_v51 = vpack.c.bf16 %v943_v50, %v942_v49 }
 0x36c   :  { %1539 = vmatprep.subr.bf16.mxu0 %v1829_v20 }
 0x36f   :  { %1541 = vmatpush3.bf16.msra.mxu0 %v1540_v54 }
 0x370   :  { %1566 = vmatprep.subr.bf16.mxu0 %v1829_v20 }
 0x425   :  { %v637_v44 = vpop.f32.mrb[4].mxu0 }
 0x426   :  { %v638_v45 = vadd.f32 %v1042_v43, %v637_v44  ;;  %v1201_v46 = vpop.f32.mrb[5].mxu0 }
 0x427   :  { %v940_v46 = vld [vmem:[#allocation14 + $0x60] sm:$0xff] }
 0x428   :  { %v641_v47 = vmul.f32 0.01, %v638_v45 }
 0x42a   :  { %v642_v48 = vmax.f32 %v638_v45, %v641_v47  ;;  %v941_v47 = vld [vmem:[#allocation14 + $0x68] sm:$0xff] }
 0x42c   :  { %1235 = vmatmul.mubr.f32.vlgmr.msra.gmra.mrb[2].mxu1 %v642_v48  ;;  %v1585_v48 = vpack.c.bf16 %v941_v47, %v940_v46 }
 0x42d   :  { %1304 = vmatprep.mubr.msk.f32.mxu1 %vm1830_vm0, %v1828_v0  ;;  %1544 = vmatpush3.bf16.msra.mxu1 %v1543_v58  ;;  %v1046_v58 = vld [vmem:[%s2148_s16] ss:$0 sm:$0xff] }
 0x42e   :  { %1545 = vmatprep.subr.bf16.mxu1 %v1829_v20 }
 0x431   :  { %1547 = vmatpush3.bf16.msra.mxu1 %v1546_v60 }
 0x432   :  { %1548 = vmatprep.subr.bf16.mxu1 %v1829_v20 }
 0x435   :  { %1550 = vmatpush3.bf16.msra.mxu1 %v1549_v63 }
 0x436   :  { %1551 = vmatprep.subr.bf16.mxu1 %v1829_v20 }
 0x439   :  { %1553 = vmatpush3.bf16.msra.mxu1 %v1552_v3 }
 0x43a   :  { %1554 = vmatprep.subr.bf16.mxu1 %v1829_v20 }
 0x43d   :  { %1556 = vmatpush3.bf16.msra.mxu1 %v1555_v6 }
 0x43e   :  { %1557 = vmatprep.subr.bf16.mxu1 %v1829_v20 }
 0x441   :  { %1559 = vmatpush3.bf16.msra.mxu1 %v1558_v9 }
 0x442   :  { %1560 = vmatprep.subr.bf16.mxu1 %v1829_v20 }
 0x445   :  { %1562 = vmatpush3.bf16.msra.mxu1 %v1561_v18 }
 0x446   :  { %1563 = vmatprep.subr.bf16.mxu1 %v1829_v20 }
 0x449   :  { %1565 = vmatpush3.bf16.msra.mxu1 %v1564_v22 }
 0x4ff   :  { %v732_v11 = vpop.f32.mrb[2].mxu1 }
 0x500   :  { %v733_v12 = vadd.f32 %v1043_v10, %v732_v11  ;;  %v1236_v13 = vpop.f32.mrb[3].mxu1 }
 0x502   :  { %v736_v14 = vmul.f32 0.01, %v733_v12 }
 0x504   :  { %v737_v15 = vmax.f32 %v733_v12, %v736_v14 }
 0x506   :  { %1270 = vmatmul.mubr.f32.vlgmr.msra.gmra.mrb[6].mxu0 %v737_v15 }
 0x507   :  { %1339 = vmatprep.mubr.msk.f32.mxu0 %vm1830_vm0, %v1828_v0  ;;  %1568 = vmatpush3.bf16.msra.mxu0 %v1567_v26  ;;  %v932_v0 = vld [vmem:[#allocation14 + $0x20] sm:$0xff] }
 0x508   :  { %1569 = vmatprep.subr.bf16.mxu0 %v1829_v20  ;;  %v1573_v30 = vpack.c.bf16 %v933_v29, %v932_v0 }
 0x50b   :  { %1571 = vmatpush3.bf16.msra.mxu0 %v1570_v28 }
 0x50c   :  { %1572 = vmatprep.subr.bf16.mxu0 %v1829_v20 }
 0x50f   :  { %1574 = vmatpush3.bf16.msra.mxu0 %v1573_v30 }
 0x510   :  { %1575 = vmatprep.subr.bf16.mxu0 %v1829_v20 }
 0x513   :  { %1577 = vmatpush3.bf16.msra.mxu0 %v1576_v33 }
 0x514   :  { %1578 = vmatprep.subr.bf16.mxu0 %v1829_v20 }
 0x517   :  { %1580 = vmatpush3.bf16.msra.mxu0 %v1579_v36 }
 0x518   :  { %1581 = vmatprep.subr.bf16.mxu0 %v1829_v20 }
 0x51b   :  { %1583 = vmatpush3.bf16.msra.mxu0 %v1582_v39 }
 0x51c   :  { %1584 = vmatprep.subr.bf16.mxu0 %v1829_v20 }
 0x51f   :  { %1586 = vmatpush3.bf16.msra.mxu0 %v1585_v48 }
 0x520   :  { %1587 = vmatprep.subr.bf16.mxu0 %v1829_v20 }
 0x523   :  { %1589 = vmatpush3.bf16.msra.mxu0 %v1588_v51 }
 0x5d9   :  { %v827_v41 = vpop.f32.mrb[6].mxu0 }
 0x5da   :  { %v828_v42 = vadd.f32 %v1044_v40, %v827_v41  ;;  %v1271_v43 = vpop.f32.mrb[7].mxu0 }
 0x5dc   :  { %v831_v44 = vmul.f32 0.01, %v828_v42 }
 0x5de   :  { %v832_v45 = vmax.f32 %v828_v42, %v831_v44 }
 0x5e0   :  { %1305 = vmatmul.mubr.f32.vlgmr.msra.gmra.mrb[4].mxu1 %v832_v45 }
 0x6b3   :  { %v922_v53 = vpop.f32.mrb[4].mxu1 }
 0x6b4   :  { %v923_v54 = vadd.f32 %v1045_v52, %v922_v53  ;;  %v1306_v55 = vpop.f32.mrb[5].mxu1 }
 0x6b6   :  { %v926_v56 = vmul.f32 0.01, %v923_v54 }
 0x6b8   :  { %v927_v57 = vmax.f32 %v923_v54, %v926_v56 }
 0x6ba   :  { %1340 = vmatmul.mubr.f32.vlgmr.msra.gmra.mrb[8].mxu0 %v927_v57 }
 0x78d   :  { %v1017_v20 = vpop.f32.mrb[8].mxu0 }
 0x78e   :  { %v1018_v59 = vadd.f32 %v1046_v58, %v1017_v20  ;;  %v1341_v60 = vpop.f32.mrb[9].mxu0 }
 0x790   :  { %1021 = vst [vmem:[#allocation16] sm:$0xff] %v1018_v59 }
 0x791   :  { %1793 = shalt.err (!%p1790_p12)
}
 0x792   :  { %s2159_s17 = sld [smem:[#allocation25_spill]] }
 0x798   :  { %s1794_s0 = scalar_lea.hbm %s2159_s17, 128 }
 0x799   :  { %p1795_p13 = scmp.ne.s32.totalorder %s2159_s17, %s1794_s0  ;;  %p1798_p0 = scmp.lt.u32.totalorder %s1794_s0, %s2159_s17 }
 0x79b   :  { %p1800_p1 = pnand %p1798_p0, %p1795_p13 }
 0x79d   :  { %1803 = shalt.err (!%p1800_p1)
}
 0x79e   :  { %1031 = dma.vmem_to_hbm [thread:$0]  %s1029_s26, 128, %s2159_s17, [#allocation4]  }
 0x79f   :  { %1814 = dma.done.wait [#allocation4], 128  }
 0x7a0   :  { %1815 = vsyncadd [#allocation4], 4294967168 }
 0x7a1   :  { %1035 = vsyncpa [#allocation3], 1 }
 0x7a2   :  { %1036 = vsyncpa [#allocation6], 1 }
 0x7a3   :  { %1037 = vsyncpa [#allocation9], 1 }
 0x7a4   :  { %1038 = vsyncpa [#allocation12], 1 }
 0x7a5   :  { %1039 = vsyncpa [#allocation15], 1 }
 0x7a6   :  { %1040 = vsyncpa [#allocation4], 1 }

</bundles_post_ra>
